<compile_context>
chip_gen: v7x
topology: tpu7x:2x2x1
jax: 0.10.0
libtpu: 0.0.40
codegen_flags: <defaults>
</compile_context>

<pallas_src>
import functools
import math

import jax
import jax.numpy as jnp
from jax.experimental import pallas as pl
from jax.experimental.pallas import tpu as pltpu


def _make_attention_kernel(*, has_mask, with_p, mxu_dtype, exp_dtype, scale,
                           fuse_out, head_block):
    """Kernel body for one (batch, head-group, q-tile) grid step."""

    def kernel(*refs):
        q_ref, k_ref, v_ref = refs[:3]
        nxt = 3
        m_ref = None
        if has_mask:
            m_ref = refs[nxt]
            nxt += 1
        out_ref = refs[nxt]
        p_ref = refs[nxt + 1] if with_p else None

        q = q_ref[0]                       # (Hb, tq, D)
        k = k_ref[0]                       # (Hb, S,  D)
        v = v_ref[0]                       # (Hb, S,  D)

        # Pre-scale Q by 1/sqrt(D): tq*D multiplies instead of tq*S later.
        qc = (q * scale).astype(mxu_dtype)
        kc = k.astype(mxu_dtype)

        # Q @ K^T contracting the last dim of both operands (no explicit K
        # transpose); MXU matmul with f32 accumulation.
        scores = jnp.einsum("hqd,hkd->hqk", qc, kc,
                            preferred_element_type=jnp.float32)   # (Hb,tq,S) f32

        if m_ref is not None:
            # int8 0/1 mask -> f32; masked_fill(mask == 0, -1e9) as mul/add
            # (avoids i1 broadcasts / selects): keep -> score, drop -> -1e9.
            m = m_ref[0].astype(jnp.float32)       # (1|Hb, 1|tq, S)
            scores = scores * m + (m - 1.0) * 1.0e9

        # Numerically stable softmax.  Row max and denominator stay in f32;
        # the exp runs in exp_dtype (bf16 on v6e/v7x halves EUP/VPU work).
        row_max = jnp.max(scores, axis=-1, keepdims=True)
        e = jnp.exp((scores - row_max).astype(exp_dtype))          # (Hb,tq,S)
        denom = jnp.sum(e, axis=-1, keepdims=True, dtype=jnp.float32)
        inv = 1.0 / denom     # exact; only Hb*tq values, negligible cost.

        # Deferred normalization: contract the un-normalized e with V and
        # scale the (Hb, tq, D) context afterwards (S/D x fewer multiplies
        # than scaling the (Hb, tq, S) probabilities before the matmul).
        ctx = jnp.einsum("hqk,hkd->hqd",
                         e.astype(mxu_dtype), v.astype(mxu_dtype),
                         preferred_element_type=jnp.float32)       # (Hb,tq,D)
        ctx = ctx * inv

        if fuse_out:
            # Lane-dense store: heads folded into the last (lane) axis.
            fused = jnp.concatenate([ctx[h] for h in range(head_block)],
                                    axis=-1)                       # (tq, Hb*D)
            out_ref[0] = fused.astype(out_ref.dtype)
        else:
            out_ref[0] = ctx.astype(out_ref.dtype)                 # (Hb,tq,D)

        if with_p:
            p_ref[0] = (e * inv.astype(e.dtype)).astype(p_ref.dtype)

        # TODO(synk): training-mode dropout (p=0.1) would use pltpu.prng_seed +
        # pltpu.prng_random_bits; the forward here is eval-mode (identity).

    return kernel


def _vmem_capacity_bytes():
    try:
        return int(pltpu.get_tpu_info().vmem_capacity_bytes)
    except Exception:
        return 64 << 20     # conservative default (v7x per-TensorCore VMEM)


def _estimate_vmem_bytes(Hb, tq, S, D, *, in_bytes, out_bytes, p_bytes,
                         mxu_bytes, exp_bytes, mask_bytes, with_p, has_mask):
    """Rough live-VMEM estimate: double-buffered blocks + in-kernel temps."""
    blocks = 2 * (Hb * tq * D * in_bytes          # q tile
                  + 2 * Hb * S * D * in_bytes)    # k, v tiles
    if has_mask:
        blocks += 2 * tq * S * mask_bytes
    blocks += 2 * Hb * tq * D * out_bytes
    if with_p:
        blocks += 2 * Hb * tq * S * p_bytes
    temps = (2 * Hb * tq * S * 4                  # f32 scores + one f32 temp
             + Hb * tq * S * exp_bytes            # e
             + (Hb * tq * D + 2 * Hb * S * D) * mxu_bytes   # casted operands
             + Hb * tq * D * 4)                   # f32 context
    return blocks + temps


def _choose_tiles(H, S, D, *, budget, fuse_out, est_fn):
    """Pick (head_block, q_tile) from a VMEM estimate instead of fixed lists."""
    head_cands = [h for h in range(min(H, 8), 0, -1) if H % h == 0]
    if fuse_out:
        # The fused output block's last dim is Hb*D: keep it a multiple of 128
        # (or the full H*D) so the BlockSpec stays legal and lane-dense.
        cands = [h for h in head_cands if (h * D) % 128 == 0]
        head_cands = cands if cands else [H]
    if S <= 512:
        tq_cands = [S] + [t for t in (256, 128, 64, 32, 16, 8) if t < S]
    else:
        tq_cands = [512, 256, 128, 64, 32]
    best = None
    for hb in head_cands:
        for tq in tq_cands:
            if est_fn(hb, tq) <= budget:
                if best is None or hb * tq > best[0]:
                    best = (hb * tq, hb, tq)
                break
    if best is None:                      # nothing fits: take the smallest tiles
        best = (0, head_cands[-1], tq_cands[-1])
    return best[1], best[2]


def attention(query, key, value, mask=None, *, return_p_attn=False,
              compute_dtype=jnp.bfloat16, exp_dtype=None,
              p_dtype=jnp.bfloat16, out_layout="bhsd"):
    """Pallas TPU forward of the BERT `Attention` module (eval mode).

    Returns (context, p_attn); p_attn is None unless return_p_attn=True (skipping
    it removes the dominant (B,H,S,S) HBM writeback).
    out_layout: "bhsd" -> context shaped (B,H,S,D) like the PyTorch module;
                "bsm"  -> lane-dense (B, S, H*D), the layout BERT consumes next.
    compute_dtype: MXU operand dtype (bf16 default = peak-rate path; f32
      accumulation and f32 softmax statistics always).  exp_dtype defaults to
      compute_dtype; pass jnp.float32 on v5e (no bf16 VPU/EUP).
    """
    if out_layout not in ("bhsd", "bsm"):
        raise ValueError(f"unknown out_layout: {out_layout!r}")
    B, H, S, D = query.shape
    mxu_dtype = jnp.dtype(compute_dtype)
    exp_dtype = jnp.dtype(exp_dtype) if exp_dtype is not None else mxu_dtype
    p_dtype = jnp.dtype(p_dtype)
    out_dtype = query.dtype
    fuse_out = out_layout == "bsm"
    has_mask = mask is not None
    with_p = bool(return_p_attn)

    if has_mask:
        mask = jnp.asarray(mask)
        if mask.ndim != 4:
            mask = mask.reshape((1,) * (4 - mask.ndim) + mask.shape)
        mb, mh, mq, mk = mask.shape
        assert mk == S and mb in (1, B) and mh in (1, H) and mq in (1, S), mask.shape
        # int8 0/1 mask: 4x less HBM traffic than f32; (B,1,1,S) key-padding
        # masks are shipped as-is (no host-side (B,1,S,S) materialization).
        mask_i8 = (mask != 0).astype(jnp.int8)

    capacity = _vmem_capacity_bytes()
    budget = max(min(capacity * 3 // 4, capacity - (16 << 20)), 16 << 20)

    est_fn = functools.partial(
        _estimate_vmem_bytes, S=S, D=D,
        in_bytes=jnp.dtype(query.dtype).itemsize,
        out_bytes=jnp.dtype(out_dtype).itemsize, p_bytes=p_dtype.itemsize,
        mxu_bytes=mxu_dtype.itemsize, exp_bytes=exp_dtype.itemsize,
        mask_bytes=1, with_p=with_p, has_mask=has_mask)
    Hb, tq = _choose_tiles(H, S, D, budget=budget, fuse_out=fuse_out,
                           est_fn=est_fn)
    Hg = H // Hb
    Qt = pl.cdiv(S, tq)

    # Grid (B, head_group, q_tile): q tiles innermost so the large K/V blocks
    # (index_map constant in qt) stay resident across q tiles; when Qt == 1 the
    # mask block (constant in hg) is the one that is not re-fetched.
    grid = (B, Hg, Qt)

    q_spec = pl.BlockSpec((1, Hb, tq, D), lambda b, hg, qt: (b, hg, qt, 0))
    kv_spec = pl.BlockSpec((1, Hb, S, D), lambda b, hg, qt: (b, hg, 0, 0))
    in_specs = [q_spec, kv_spec, kv_spec]
    inputs = [query, key, value]

    if has_mask:
        mask_block = (1, Hb if mh == H else 1, tq if mq == S else 1, S)

        def mask_index(b, hg, qt):
            return (b if mb == B else 0,
                    hg if mh == H else 0,
                    qt if mq == S else 0,
                    0)

        in_specs.append(pl.BlockSpec(mask_block, mask_index))
        inputs.append(mask_i8)

    if fuse_out:
        out_shapes = [jax.ShapeDtypeStruct((B, S, H * D), out_dtype)]
        out_specs = [pl.BlockSpec((1, tq, Hb * D), lambda b, hg, qt: (b, qt, hg))]
    else:
        out_shapes = [jax.ShapeDtypeStruct((B, H, S, D), out_dtype)]
        out_specs = [pl.BlockSpec((1, Hb, tq, D), lambda b, hg, qt: (b, hg, qt, 0))]
    if with_p:
        out_shapes.append(jax.ShapeDtypeStruct((B, H, S, S), p_dtype))
        out_specs.append(
            pl.BlockSpec((1, Hb, tq, S), lambda b, hg, qt: (b, hg, qt, 0)))

    vmem_limit = int(min(max(est_fn(Hb, tq) + (8 << 20), 32 << 20), budget))

    kernel = _make_attention_kernel(
        has_mask=has_mask, with_p=with_p, mxu_dtype=mxu_dtype,
        exp_dtype=exp_dtype, scale=1.0 / math.sqrt(D), fuse_out=fuse_out,
        head_block=Hb)

    outs = pl.pallas_call(
        kernel,
        out_shape=tuple(out_shapes),
        grid_spec=pltpu.PrefetchScalarGridSpec(
            num_scalar_prefetch=0,
            grid=grid,
            in_specs=in_specs,
            out_specs=tuple(out_specs),
        ),
        compiler_params=pltpu.CompilerParams(
            dimension_semantics=("parallel", "parallel", "parallel"),
            vmem_limit_bytes=vmem_limit,
        ),
    )(*inputs)

    # TODO(synk): flash-style K-axis grid (online softmax with running max/sum
    # scratch) for S >= 2048 so per-step VMEM is O(tq*tk) instead of O(tq*S).

    if with_p:
        return outs[0], outs[1]
    return outs[0], None


def _reference(query, key, value, mask):
    d = query.shape[-1]
    scores = jnp.einsum("bhqd,bhkd->bhqk", query, key) / math.sqrt(d)
    if mask is not None:
        scores = jnp.where(mask == 0, -1.0e9, scores)
    p = jax.nn.softmax(scores, axis=-1)
    return jnp.einsum("bhqk,bhkd->bhqd", p, value), p


if __name__ == "__main__":
    root = jax.random.PRNGKey(0)
    kq, kk, kv, km = jax.random.split(root, 4)

    B, H, S, D = 2, 4, 8, 32
    query = jax.random.normal(kq, (B, H, S, D), dtype=jnp.float32)
    key_t = jax.random.normal(kk, (B, H, S, D), dtype=jnp.float32)
    value = jax.random.normal(kv, (B, H, S, D), dtype=jnp.float32)
    # 0/1 mask broadcast over heads like PyTorch (B, 1, S, S).
    mask = (jax.random.uniform(km, (B, 1, S, S)) > 0.2).astype(jnp.float32)

    ref_out, ref_p = _reference(query, key_t, value, mask)

    # 1) Strict-precision path (f32 MXU operands, f32 softmax, exact division):
    #    matches the PyTorch module's (context, p_attn) return.
    out, p_attn = attention(query, key_t, value, mask, return_p_attn=True,
                            compute_dtype=jnp.float32, p_dtype=jnp.float32)
    out, p_attn = jax.block_until_ready((out, p_attn))
    assert out.shape == (B, H, S, D) and p_attn.shape == (B, H, S, S)
    assert jnp.allclose(out, ref_out, atol=2e-3, rtol=2e-3)
    assert jnp.allclose(p_attn, ref_p, atol=2e-3, rtol=2e-3)

    # 2) Default fast path: bf16 MXU operands + bf16 exp, deferred softmax
    #    normalization, no p_attn HBM writeback.
    out2, p_none = attention(query, key_t, value, mask)
    out2 = jax.block_until_ready(out2)
    assert p_none is None
    assert jnp.allclose(out2, ref_out, atol=5e-2, rtol=5e-2)

    # 3) No-mask fast path (no mask DMA, no masking math), strict precision.
    ref_out3, ref_p3 = _reference(query, key_t, value, None)
    out3, p3 = attention(query, key_t, value, None, return_p_attn=True,
                         compute_dtype=jnp.float32, p_dtype=jnp.float32)
    out3, p3 = jax.block_until_ready((out3, p3))
    assert jnp.allclose(out3, ref_out3, atol=2e-3, rtol=2e-3)
    assert jnp.allclose(p3, ref_p3, atol=2e-3, rtol=2e-3)

    # 4) Key-padding mask (B, 1, 1, S): shipped as-is (no (B,1,S,S) broadcast).
    kp_mask = (jax.random.uniform(km, (B, 1, 1, S)) > 0.3).astype(jnp.float32)
    ref_out4, _ = _reference(query, key_t, value, kp_mask)
    out4, _ = attention(query, key_t, value, kp_mask, compute_dtype=jnp.float32)
    out4 = jax.block_until_ready(out4)
    assert jnp.allclose(out4, ref_out4, atol=2e-3, rtol=2e-3)

    # 5) Lane-dense fused output layout (B, S, H*D) — what BERT consumes next.
    out5, _ = attention(query, key_t, value, mask, out_layout="bsm",
                        compute_dtype=jnp.float32)
    out5 = jax.block_until_ready(out5)
    ref_fused = jnp.transpose(ref_out, (0, 2, 1, 3)).reshape(B, S, H * D)
    assert jnp.allclose(out5, ref_fused, atol=2e-3, rtol=2e-3)

    # 6) bf16 p_attn writeback (halved HBM traffic vs f32), loose tolerance.
    out6, p6 = attention(query, key_t, value, mask, return_p_attn=True)
    out6, p6 = jax.block_until_ready((out6, p6))
    assert p6.dtype == jnp.bfloat16
    assert jnp.allclose(p6.astype(jnp.float32), ref_p, atol=5e-2, rtol=5e-2)

    print("KERNEL_OK")
</pallas_src>

<mosaic_0001>
module attributes {stable_mosaic.version = 11 : i64} {
  func.func @kernel(%arg0: i32, %arg1: i32, %arg2: i32, %arg3: memref<1x4x8x32xf32, #tpu.memory_space<vmem>>, %arg4: memref<1x4x8x32xf32, #tpu.memory_space<vmem>>, %arg5: memref<1x4x8x32xf32, #tpu.memory_space<vmem>>, %arg6: memref<1x1x8x8xi8, #tpu.memory_space<vmem>>, %arg7: memref<1x4x8x32xf32, #tpu.memory_space<vmem>>, %arg8: memref<1x4x8x8xf32, #tpu.memory_space<vmem>>) attributes {dimension_semantics = [#tpu.dimension_semantics<parallel>, #tpu.dimension_semantics<parallel>, #tpu.dimension_semantics<parallel>], iteration_bounds = array<i64: 2, 1, 1>, scalar_prefetch = 0 : i64, scratch_operands = 0 : i64, tpu.core_type = #tpu.core_type<tc>, window_params = [{transform_indices = @transform_0, window_bounds = array<i64: 1, 4, 8, 32>}, {transform_indices = @transform_1, window_bounds = array<i64: 1, 4, 8, 32>}, {transform_indices = @transform_2, window_bounds = array<i64: 1, 4, 8, 32>}, {transform_indices = @transform_3, window_bounds = array<i64: 1, 1, 8, 8>}, {transform_indices = @transform_4, window_bounds = array<i64: 1, 4, 8, 32>}, {transform_indices = @transform_5, window_bounds = array<i64: 1, 4, 8, 8>}]} {
    %c0 = arith.constant 0 : index
    %c0_0 = arith.constant 0 : index
    %c0_1 = arith.constant 0 : index
    %c0_2 = arith.constant 0 : index
    %0 = vector.load %arg3[%c0, %c0_0, %c0_1, %c0_2] : memref<1x4x8x32xf32, #tpu.memory_space<vmem>>, vector<1x4x8x32xf32>
    %1 = vector.shape_cast %0 : vector<1x4x8x32xf32> to vector<4x8x32xf32>
    %c0_3 = arith.constant 0 : index
    %c0_4 = arith.constant 0 : index
    %c0_5 = arith.constant 0 : index
    %c0_6 = arith.constant 0 : index
    %2 = vector.load %arg4[%c0_3, %c0_4, %c0_5, %c0_6] : memref<1x4x8x32xf32, #tpu.memory_space<vmem>>, vector<1x4x8x32xf32>
    %3 = vector.shape_cast %2 : vector<1x4x8x32xf32> to vector<4x8x32xf32>
    %c0_7 = arith.constant 0 : index
    %c0_8 = arith.constant 0 : index
    %c0_9 = arith.constant 0 : index
    %c0_10 = arith.constant 0 : index
    %4 = vector.load %arg5[%c0_7, %c0_8, %c0_9, %c0_10] : memref<1x4x8x32xf32, #tpu.memory_space<vmem>>, vector<1x4x8x32xf32>
    %5 = vector.shape_cast %4 : vector<1x4x8x32xf32> to vector<4x8x32xf32>
    %cst = arith.constant 0.176776692 : f32
    %6 = vector.broadcast %cst : f32 to vector<4x8x32xf32>
    %7 = arith.mulf %1, %6 : vector<4x8x32xf32>
    "tpu.trace_start"() <{level = 10 : i32, message = "hqd,hkd->hqk"}> : () -> ()
    %cst_11 = arith.constant dense<0.000000e+00> : vector<4x8x8xf32>
    %8 = tpu.matmul %7, %3, %cst_11 {dimension_numbers = #tpu.dot_dimension_numbers<[2], [2], [1], [1], [0, 0, 0, 1, 1, 1], [0], [0]>} : vector<4x8x32xf32>, vector<4x8x32xf32>, vector<4x8x8xf32> -> vector<4x8x8xf32>
    "tpu.trace_stop"() : () -> ()
    %c0_12 = arith.constant 0 : index
    %c0_13 = arith.constant 0 : index
    %c0_14 = arith.constant 0 : index
    %c0_15 = arith.constant 0 : index
    %9 = vector.load %arg6[%c0_12, %c0_13, %c0_14, %c0_15] : memref<1x1x8x8xi8, #tpu.memory_space<vmem>>, vector<1x1x8x8xi8>
    %10 = vector.shape_cast %9 : vector<1x1x8x8xi8> to vector<1x8x8xi8>
    %11 = arith.sitofp %10 : vector<1x8x8xi8> to vector<1x8x8xf32>
    %12 = vector.broadcast %11 : vector<1x8x8xf32> to vector<4x8x8xf32>
    %13 = arith.mulf %8, %12 : vector<4x8x8xf32>
    %cst_16 = arith.constant 1.000000e+00 : f32
    %14 = vector.broadcast %cst_16 : f32 to vector<1x8x8xf32>
    %15 = arith.subf %11, %14 : vector<1x8x8xf32>
    %cst_17 = arith.constant 1.000000e+09 : f32
    %16 = vector.broadcast %cst_17 : f32 to vector<1x8x8xf32>
    %17 = arith.mulf %15, %16 : vector<1x8x8xf32>
    %18 = vector.broadcast %17 : vector<1x8x8xf32> to vector<4x8x8xf32>
    %19 = arith.addf %13, %18 : vector<4x8x8xf32>
    %cst_18 = arith.constant dense<0xFF800000> : vector<4x8xf32>
    %20 = vector.multi_reduction <maximumf>, %19, %cst_18 [2] : vector<4x8x8xf32> to vector<4x8xf32>
    %21 = vector.shape_cast %20 : vector<4x8xf32> to vector<4x8x1xf32>
    %22 = vector.broadcast %21 : vector<4x8x1xf32> to vector<4x8x8xf32>
    %23 = arith.subf %19, %22 : vector<4x8x8xf32>
    %24 = math.exp %23 : vector<4x8x8xf32>
    %cst_19 = arith.constant dense<0.000000e+00> : vector<4x8xf32>
    %25 = vector.multi_reduction <add>, %24, %cst_19 [2] : vector<4x8x8xf32> to vector<4x8xf32>
    %26 = vector.shape_cast %25 : vector<4x8xf32> to vector<4x8x1xf32>
    %cst_20 = arith.constant 1.000000e+00 : f32
    %27 = vector.broadcast %cst_20 : f32 to vector<4x8x1xf32>
    %28 = arith.divf %27, %26 : vector<4x8x1xf32>
    "tpu.trace_start"() <{level = 10 : i32, message = "hqk,hkd->hqd"}> : () -> ()
    %cst_21 = arith.constant dense<0.000000e+00> : vector<4x8x32xf32>
    %29 = tpu.matmul %24, %5, %cst_21 {dimension_numbers = #tpu.dot_dimension_numbers<[2], [1], [1], [2], [0, 0, 0, 1, 1, 2], [0], [0]>} : vector<4x8x8xf32>, vector<4x8x32xf32>, vector<4x8x32xf32> -> vector<4x8x32xf32>
    "tpu.trace_stop"() : () -> ()
    %30 = vector.broadcast %28 : vector<4x8x1xf32> to vector<4x8x32xf32>
    %31 = arith.mulf %29, %30 : vector<4x8x32xf32>
    %c0_22 = arith.constant 0 : index
    %c0_23 = arith.constant 0 : index
    %c0_24 = arith.constant 0 : index
    %c0_25 = arith.constant 0 : index
    %32 = vector.load %arg7[%c0_22, %c0_23, %c0_24, %c0_25] : memref<1x4x8x32xf32, #tpu.memory_space<vmem>>, vector<1x4x8x32xf32>
    %33 = vector.shape_cast %32 : vector<1x4x8x32xf32> to vector<4x8x32xf32>
    %34 = vector.shape_cast %31 : vector<4x8x32xf32> to vector<1x4x8x32xf32>
    tpu.vector_store %arg7[%c0_22, %c0_23, %c0_24, %c0_25], %34 {strides = array<i32>} : memref<1x4x8x32xf32, #tpu.memory_space<vmem>>, vector<1x4x8x32xf32>,
    %35 = vector.broadcast %28 : vector<4x8x1xf32> to vector<4x8x8xf32>
    %36 = arith.mulf %24, %35 : vector<4x8x8xf32>
    %c0_26 = arith.constant 0 : index
    %c0_27 = arith.constant 0 : index
    %c0_28 = arith.constant 0 : index
    %c0_29 = arith.constant 0 : index
    %37 = vector.load %arg8[%c0_26, %c0_27, %c0_28, %c0_29] : memref<1x4x8x8xf32, #tpu.memory_space<vmem>>, vector<1x4x8x8xf32>
    %38 = vector.shape_cast %37 : vector<1x4x8x8xf32> to vector<4x8x8xf32>
    %39 = vector.shape_cast %36 : vector<4x8x8xf32> to vector<1x4x8x8xf32>
    tpu.vector_store %arg8[%c0_26, %c0_27, %c0_28, %c0_29], %39 {strides = array<i32>} : memref<1x4x8x8xf32, #tpu.memory_space<vmem>>, vector<1x4x8x8xf32>,
    return
  }
  func.func @transform_0(%arg0: i32, %arg1: i32, %arg2: i32) -> (i32, i32, i32, i32) {
    %c0_i32 = arith.constant 0 : i32
    %c0_i32_0 = arith.constant 0 : i32
    return %arg0, %arg1, %arg2, %c0_i32 : i32, i32, i32, i32
  }
  func.func @transform_1(%arg0: i32, %arg1: i32, %arg2: i32) -> (i32, i32, i32, i32) {
    %c0_i32 = arith.constant 0 : i32
    %c0_i32_0 = arith.constant 0 : i32
    %c0_i32_1 = arith.constant 0 : i32
    return %arg0, %arg1, %c0_i32, %c0_i32_0 : i32, i32, i32, i32
  }
  func.func @transform_2(%arg0: i32, %arg1: i32, %arg2: i32) -> (i32, i32, i32, i32) {
    %c0_i32 = arith.constant 0 : i32
    %c0_i32_0 = arith.constant 0 : i32
    %c0_i32_1 = arith.constant 0 : i32
    return %arg0, %arg1, %c0_i32, %c0_i32_0 : i32, i32, i32, i32
  }
  func.func @transform_3(%arg0: i32, %arg1: i32, %arg2: i32) -> (i32, i32, i32, i32) {
    %c0_i32 = arith.constant 0 : i32
    %c0_i32_0 = arith.constant 0 : i32
    %c0_i32_1 = arith.constant 0 : i32
    return %arg0, %c0_i32, %arg2, %c0_i32_0 : i32, i32, i32, i32
  }
  func.func @transform_4(%arg0: i32, %arg1: i32, %arg2: i32) -> (i32, i32, i32, i32) {
    %c0_i32 = arith.constant 0 : i32
    %c0_i32_0 = arith.constant 0 : i32
    return %arg0, %arg1, %arg2, %c0_i32 : i32, i32, i32, i32
  }
  func.func @transform_5(%arg0: i32, %arg1: i32, %arg2: i32) -> (i32, i32, i32, i32) {
    %c0_i32 = arith.constant 0 : i32
    %c0_i32_0 = arith.constant 0 : i32
    return %arg0, %arg1, %arg2, %c0_i32 : i32, i32, i32, i32
  }
}

</mosaic_0001>

<bundles_post_ra>
// kernel: tpu_custom_call.1
= control target key start
LH: loop header
LB: loop body
LE: loop exit
PB: predicated region body
PF: predicated region fallthrough
CT: control target
= control target key end

     0   :  { %s2161_s0 = inlined_call_operand.hbm [shape: f32[2,4,8,32], index: 0, kind: input, shape index: {}]   ;;  %s2162_s1 = inlined_call_operand.hbm [shape: f32[2,4,8,32], index: 1, kind: input, shape index: {}]   ;;  %s2163_s2 = inlined_call_operand.hbm [shape: f32[2,4,8,32], index: 2, kind: input, shape index: {}]   ;;  %s2164_s3 = inlined_call_operand.vmem [shape: s8[2,1,8,8], index: 3, kind: input, shape index: {}]   ;;  %s2165_s4 = inlined_call_operand.hbm [shape: f32[2,4,8,32], index: 4, kind: output, shape index: {0}]   ;;  %s2166_s5 = inlined_call_operand.hbm [shape: f32[2,4,8,8], index: 5, kind: output, shape index: {1}]  }
   0x1   :  { %2179 = sst [smem:[#allocation20_spill]] %s2162_s1 }
   0x2   :  { %11 = vsyncpa [#allocation3], 0 }
   0x3   :  { %13 = vsyncpa [#allocation3 + $0x1], 0 }
   0x4   :  { %14 = vsyncpa [#allocation6], 0 }
   0x5   :  { %16 = vsyncpa [#allocation6 + $0x1], 0 }
   0x6   :  { %17 = vsyncpa [#allocation4], 0 }
   0x7   :  { %19 = vsyncpa [#allocation4 + $0x1], 0 }
   0x8   :  { %20 = vsyncpa [#allocation10], 0 }
   0x9   :  { %22 = vsyncpa [#allocation10 + $0x1], 0  ;;  %s1778_s18 = smov 0   ;;  %s1780_s19 = smov 0  }
   0xa   :  { %s1782_s20 = smov 0   ;;  %s1784_s21 = smov 0  }
   0xb   :  { %s1786_s22 = smov 0   ;;  %s1788_s23 = smov 0  }
   0xc LB: > { %2180 = sst [smem:[#allocation15_spill]] %s1731_s22  ;;  %s1809_s24 = sadd.s32 4294967295, %s1735_s23   ;;  %s1735_s23 = sphi %s1788_s23, %s28_s23   ;;  %s1731_s22 = sphi %s1786_s22, %s2207_s22   ;;  %s1727_s21 = sphi %s1784_s21, %s2206_s21   ;;  %s1723_s20 = sphi %s1782_s20, %s2210_s20   ;;  %s1719_s19 = sphi %s1780_s19, %s2209_s19   ;;  %s1715_s18 = sphi %s1778_s18, %s2208_s18  }
   0xd   : > { %2181 = sst [smem:[#allocation16_spill]] %s1735_s23  ;;  %s1327_s25 = sadd.s32 4294967294, %s1735_s23  }
   0xe   : > { %s47_s26 = sadd.s32 1, %s1731_s22  ;;  %s58_s27 = sadd.s32 1, %s1723_s20 }
   0xf   : > { %p49_p0 = scmp.ge.s32.totalorder %s47_s26, 2  ;;  %p65_p1 = scmp.ne.s32.totalorder %s1723_s20, %s1719_s19 }
  0x10   : > { %p66_p2 = scmp.eq.s32.totalorder %s1735_s23, 0  ;;  %p71_p3 = scmp.ne.s32.totalorder %s1719_s19, %s1715_s18 }
  0x11   : > { %s2212_s26 = smov (%p49_p0, %s47_s26), 0  ;;  %p72_p5 = scmp.eq.s32.totalorder %s1809_s24, 0 }
  0x12   : > { %2182 = sst [smem:[#allocation17_spill]] %s2212_s26  ;;  %p1821_p4 = por %p66_p2, %p65_p1 }
  0x13   : > { %s51_s29 = ssub.s32 %s1731_s22, %s2212_s26  ;;  %p183_p6 = scmp.eq.s32.totalorder %s1809_s24, 1 }
  0x14   : > { %p56_p7 = scmp.eq.s32.totalorder %s51_s29, 0  ;;  %p1829_p8 = por %p72_p5, %p71_p3 }
  0x15   : > { %p1833_p9 = por %p183_p6, %p65_p1  ;;  %p189_p10 = scmp.eq.s32.totalorder %s1327_s25, 1 }
  0x16   : > { %s2184_s30 = scalar_select %p1829_p8, 1, 0 }
  0x17   : > { %s2185_s6 = scalar_select %p1833_p9, 1, 0 }
  0x18   : > { %s1838_s7 = scalar_select %p56_p7, %s1723_s20, %s58_s27  }
  0x19   : > { %p1840_p11 = por %p189_p10, %p71_p3  ;;  %p1455_p13 = scmp.lt.s32.totalorder %s1735_s23, 2 }
  0x1a   : > { %2186 = sst [smem:[#allocation18_spill]] %s1838_s7  ;;  %s2167_s9 = sand.u32 1, %s1723_s20  }
  0x1b   : > { %s2187_s8 = scalar_select %p1840_p11, 1, 0 }
  0x1c   : > { %s1849_s10 = sshll.u32 %s2167_s9, 5  ;;  %s1852_s11 = sshll.u32 %s1731_s22, 9 }
  0x1d   : > { %2188 = sst [smem:[#allocation19_spill]] %s2187_s8  ;;  %p1856_p0 = pnand %p1455_p13, %p1821_p4 }
  0x1e   : > { %s263_s13 = sand.u32 1, %s1735_s23   ;;  %s2190_s1 = sld [smem:[#allocation20_spill]] }
  0x1f   : > { %s267_s17 = scalar_lea.vmem [#allocation5], %s1849_s10  ;;  %s1872_s27 = scalar_lea.sflag [#allocation6], %s263_s13 }
  0x20   : > { %s276_s25 = sshll.u32 %s267_s17, 4  ;;  %p1878_p4 = pneg %p1856_p0  ;;  %s1869_s25 = int_to_ptr.vmem [resolvable:$true] %s276_s25 }
  0x24   : > { %s1865_s16 = scalar_lea.hbm %s2190_s1, %s1852_s11  ;;  %s1532_s17 = scalar_lea.hbm %s2190_s1, 1024 }
  0x25   : > { %s1527_s28 = scalar_lea.hbm %s1865_s16, 512  ;;  %p1533_p7 = scmp.lt.u32.totalorder %s1865_s16, %s2190_s1 }
  0x26   : > { %p1528_p3 = scmp.ne.s32.totalorder %s1865_s16, %s1527_s28  ;;  %p1534_p10 = scmp.lt.u32.totalorder %s1532_s17, %s1527_s28 }
  0x27   : > { %p1536_p12 = scmp.lt.u32.totalorder %s1527_s28, %s1865_s16 }
  0x28   : > { %p1530_p5 = pnand %p1878_p4, %p1528_p3  ;;  %p1535_p13 = por %p1534_p10, %p1533_p7 }
  0x2a   : > { %p1531_p6 = pneg %p1530_p5  ;;  %p1537_p1 = por %p1536_p12, %p1535_p13 }
  0x2c   : > { %p1538_p2 = pnand %p1537_p1, %p1531_p6 }
  0x2e   : > { %1541 = shalt.err (!%p1538_p2)
}
  0x2f   : > { %s1542_s13 = scalar_lea.vmem %s1869_s25, 512  ;;  %s1737_s14 = smov [#allocation5]  }
  0x30   : > { %p1543_p3 = scmp.ne.s32.totalorder %s1869_s25, %s1542_s13  ;;  %s1547_s15 = sshll.u32 %s1737_s14, 4  ;;  %s1548_s15 = int_to_ptr.vmem [resolvable:$false] %s1547_s15 }
  0x31   : > { %s1549_s26 = scalar_lea.vmem %s1548_s15, 1024  ;;  %p1550_p9 = scmp.lt.s32.totalorder %s1869_s25, %s1548_s15 }
  0x32   : > { %p1545_p5 = pnand %p1543_p3, %p1878_p4  ;;  %p1551_p8 = scmp.lt.s32.totalorder %s1549_s26, %s1542_s13 }
  0x34   : > { %p1546_p11 = pneg %p1545_p5  ;;  %p1552_p7 = por %p1551_p8, %p1550_p9 }
  0x36   : > { %p1553_p10 = pnand %p1552_p7, %p1546_p11 }
  0x38   : > { %1556 = shalt.err (!%p1553_p10)
}
  0x39   : > { %s2171_s9 = smov 128   ;;  %s2173_s28 = smov 8  }
  0x3a   : > { %1444 = dma.hbm_to_vmem [thread:$0]  (!%p1856_p0), %s1865_s16, 512, %s1869_s25, %s1872_s27, %s2171_s9, %s2171_s9, %s2173_s28  }
  0x3b   : > { %p2192_p8 = scmp.lt.s32.totalorder %s1735_s23, 3  ;;  %p2193_p9 = scmp.ge.s32.totalorder %s1735_s23, 1 }
  0x3c   : > { %s1917_s15 = scalar_lea.hbm %s2161_s0, %s1852_s11  ;;  %s243_s26 = scalar_lea.vmem [#allocation2], %s1849_s10 }
  0x3d   : > { %p1909_p11 = pnand %p2193_p9, %p2192_p8  ;;  %s253_s1 = sshll.u32 %s243_s26, 4  ;;  %s1920_s1 = int_to_ptr.vmem [resolvable:$true] %s253_s1 }
  0x3e   : > { %s1926_s9 = scalar_lea.hbm %s2163_s2, %s1852_s11  ;;  %s2195_s28 = sand.u32 1, %s1723_s20  }
  0x3f   : > { %s2194_s17 = scalar_select %p1909_p11, 1, 0 }
  0x40   : > { %s1930_s22 = scalar_lea.sflag [#allocation3], %s2195_s28  ;;  %s1557_s7 = scalar_lea.hbm %s1917_s15, 512 }
  0x41   : > { %p1558_p12 = scmp.ne.s32.totalorder %s1917_s15, %s1557_s7  ;;  %s1562_s23 = scalar_lea.hbm %s2161_s0, 1024 }
  0x42   : > { %p1563_p6 = scmp.lt.u32.totalorder %s1917_s15, %s2161_s0  ;;  %p1564_p13 = scmp.lt.u32.totalorder %s1562_s23, %s1557_s7 }
  0x43   : > { %p1560_p1 = pnand %p1558_p12, %p1878_p4  ;;  %p1566_p5 = scmp.lt.u32.totalorder %s1557_s7, %s1917_s15 }
  0x44   : > { %p1565_p3 = por %p1564_p13, %p1563_p6 }
  0x45   : > { %p1561_p2 = pneg %p1560_p1 }
  0x46   : > { %p1567_p7 = por %p1566_p5, %p1565_p3 }
  0x48   : > { %p1568_p10 = pnand %p1567_p7, %p1561_p2 }
  0x4a   : > { %1571 = shalt.err (!%p1568_p10)
}
  0x4b   : > { %s1572_s11 = scalar_lea.vmem %s1920_s1, 512  ;;  %s1740_s28 = smov [#allocation2]  }
  0x4c   : > { %p1573_p8 = scmp.ne.s32.totalorder %s1920_s1, %s1572_s11  ;;  %s1577_s16 = sshll.u32 %s1740_s28, 4  ;;  %s1578_s16 = int_to_ptr.vmem [resolvable:$false] %s1577_s16 }
  0x4d   : > { %s1579_s8 = scalar_lea.vmem %s1578_s16, 1024  ;;  %p1580_p1 = scmp.lt.s32.totalorder %s1920_s1, %s1578_s16 }
  0x4e   : > { %p1575_p9 = pnand %p1573_p8, %p1878_p4  ;;  %p1581_p11 = scmp.lt.s32.totalorder %s1579_s8, %s1572_s11 }
  0x50   : > { %p1576_p12 = pneg %p1575_p9  ;;  %p1582_p6 = por %p1581_p11, %p1580_p1 }
  0x52   : > { %p1583_p13 = pnand %p1582_p6, %p1576_p12 }
  0x54   : > { %1586 = shalt.err (!%p1583_p13)
}
  0x55   : > { %s2196_s23 = smov 8   ;;  %s2197_s7 = smov 128  }
  0x56   : > { %1441 = dma.hbm_to_vmem [thread:$0]  (!%p1856_p0), %s1917_s15, 512, %s1920_s1, %s1930_s22, %s2197_s7, %s2197_s7, %s2196_s23  }
  0x57   : > { %s290_s25 = scalar_lea.vmem [#allocation7], %s1849_s10  ;;  %s1587_s14 = scalar_lea.hbm %s1926_s9, 512 }
  0x58   : > { %s299_s13 = sshll.u32 %s290_s25, 4  ;;  %p1588_p11 = scmp.ne.s32.totalorder %s1926_s9, %s1587_s14  ;;  %s1958_s13 = int_to_ptr.vmem [resolvable:$true] %s299_s13 }
  0x59   : > { %s1592_s28 = scalar_lea.hbm %s2163_s2, 1024  ;;  %p1593_p5 = scmp.lt.u32.totalorder %s1926_s9, %s2163_s2 }
  0x5a   : > { %p1590_p2 = pnand %p1588_p11, %p1878_p4  ;;  %p1594_p7 = scmp.lt.u32.totalorder %s1592_s28, %s1587_s14 }
  0x5b   : > { %p1596_p8 = scmp.lt.u32.totalorder %s1587_s14, %s1926_s9 }
  0x5c   : > { %p1591_p3 = pneg %p1590_p2  ;;  %p1595_p10 = por %p1594_p7, %p1593_p5 }
  0x5e   : > { %p1597_p9 = por %p1596_p8, %p1595_p10 }
  0x60   : > { %p1598_p12 = pnand %p1597_p9, %p1591_p3 }
  0x62   : > { %1601 = shalt.err (!%p1598_p12)
}
  0x63   : > { %s1602_s1 = scalar_lea.vmem %s1958_s13, 512  ;;  %s1741_s22 = smov [#allocation7]  }
  0x64   : > { %p1603_p1 = scmp.ne.s32.totalorder %s1958_s13, %s1602_s1  ;;  %s1607_s10 = sshll.u32 %s1741_s22, 4  ;;  %s1608_s10 = int_to_ptr.vmem [resolvable:$false] %s1607_s10 }
  0x65   : > { %s1609_s15 = scalar_lea.vmem %s1608_s10, 1024  ;;  %p1610_p11 = scmp.lt.s32.totalorder %s1958_s13, %s1608_s10 }
  0x66   : > { %p1605_p6 = pnand %p1603_p1, %p1878_p4  ;;  %p1611_p2 = scmp.lt.s32.totalorder %s1609_s15, %s1602_s1 }
  0x68   : > { %p1606_p13 = pneg %p1605_p6  ;;  %p1612_p5 = por %p1611_p2, %p1610_p11 }
  0x6a   : > { %p1613_p7 = pnand %p1612_p5, %p1606_p13 }
  0x6c   : > { %1616 = shalt.err (!%p1613_p7)
}
  0x6d   : > { %1447 = dma.hbm_to_vmem [thread:$0]  (!%p1856_p0), %s1926_s9, 512, %s1958_s13, %s1872_s27, %s2197_s7, %s2197_s7, %s2196_s23  }
  0x6e   : > { %p2198_p4 = scmp.ne.s32.totalorder %s2194_s17, 0 }
  0x6f   : > { %s1988_s29 = sand.u32 (!%p2198_p4), 1, %s1719_s19   ;;  %p2199_p3 = scmp.ne.s32.totalorder (!%p2198_p4), %s2184_s30, 0 }
  0x70   : > { %321 = sbr.rel (%p2198_p4) target bundleno = 739 (0x2e3), region = 36  ;;  %s1991_s25 = sshll.u32 (!%p2198_p4), %s1988_s29, 5 }
  0x71   : > { %s324_s12 = scalar_lea.sflag (!%p2198_p4), [#allocation3], %s1988_s29  ;;  %s327_s14 = scalar_lea.vmem (!%p2198_p4), [#allocation2], %s1991_s25 }
  0x77   : > { %1698 = dma.done.wait (%p2199_p3), %s324_s12, 512  }
  0x78   : > { %1700 = vsyncadd (%p2199_p3), %s324_s12, 4294966784  ;;  %s332_s27 = sand.u32 1, %s1809_s24   ;;  %s336_s17 = scalar_lea.vmem [#allocation5], %s1991_s25 }
  0x79   : > { %s333_s9 = scalar_lea.sflag [#allocation6], %s332_s27 }
  0x7a   : > { %1702 = dma.done.wait (%p2199_p3), %s333_s9, 1024  }
  0x7b   : > { %1704 = vsyncadd (%p2199_p3), %s333_s9, 4294966272  ;;  %v1742_v0 = vmov 0.0   ;;  %vm1743_vm0 = vmmov 0   ;;  %vm422_vm1 = vcmask 261120   ;;  %v410_v1 = vld [vmem:[%s336_s17] sm:$0xff]  ;;  %v411_v3 = vld [vmem:[%s336_s17 + $0x8] sm:$0xff] }
  0x7c   : > { %1388 = vmatprep.subr.mxu0 %v1742_v0  ;;  %1390 = vmatprep.mubr.msk.f32.mxu0 %vm1743_vm0, %v1742_v0  ;;  %v406_v2 = vld [vmem:[%s327_s14] sm:$0xff]  ;;  %v407_v5 = vld [vmem:[%s327_s14 + $0x8] sm:$0xff]  ;;  %v408_v6 = vld [vmem:[%s327_s14 + $0x10] sm:$0xff]  ;;  %p397_p0 = scmp.lt.s32.totalorder %s1727_s21, 1  ;;  %vm740_vm2 = vcmask 64512   ;;  %s345_s26 = scalar_lea.vmem [#allocation7], %s1991_s25 }
  0x7d   : > { %1393 = vmatprep.subr.mxu1 %v1742_v0  ;;  %1395 = vmatprep.mubr.msk.f32.mxu1 %vm1743_vm0, %v1742_v0  ;;  %v418_v4 = vmul.f32 0.17677669, %v406_v2  ;;  %v412_v7 = vld [vmem:[%s336_s17 + $0x10] sm:$0xff]  ;;  %v419_v8 = vmul.f32 0.17677669, %v407_v5  ;;  %v409_v9 = vld [vmem:[%s327_s14 + $0x18] sm:$0xff] }
  0x7e   : > { %1389 = vmatpush3.xpose.msk.msra.mxu0 %vm422_vm1, %v410_v1  ;;  %1394 = vmatpush3.xpose.msk.msra.mxu1 %vm422_vm1, %v411_v3  ;;  %v413_v10 = vld [vmem:[%s336_s17 + $0x18] sm:$0xff]  ;;  %v420_v11 = vmul.f32 0.17677669, %v408_v6  ;;  %v421_v12 = vmul.f32 0.17677669, %v409_v9  ;;  %s398_s24 = scalar_select %p397_p0, %s1727_s21, 1 }
  0x7f   : > { %1398 = vmatprep.subr.mxu0 %v1742_v0  ;;  %1403 = vmatprep.subr.mxu1 %v1742_v0  ;;  %v414_v38 = vld [vmem:[%s345_s26] sm:$0xff]  ;;  %v415_v39 = vld [vmem:[%s345_s26 + $0x8] sm:$0xff]  ;;  %v416_v52 = vld [vmem:[%s345_s26 + $0x10] sm:$0xff]  ;;  %s393_s11 = scalar_lea.vmem [#allocation9], %s1991_s25  ;;  %s1370_s28 = sshll.u32 %s1727_s21, 9 }
  0x80   : > { %s1345_s30 = sshll.u32 %s398_s24, 1  ;;  %v417_v55 = vld [vmem:[%s345_s26 + $0x18] sm:$0xff]  ;;  %s1134_s16 = sshll.u32 %s393_s11, 4  ;;  %s2067_s16 = int_to_ptr.vmem [resolvable:$true] %s1134_s16 }
  0x81   : > { %1391 = vmatmul.mubr.msk.f32.vlgmr.msra.gmra.mrb[0].mxu0 %vm422_vm1, %v418_v4  ;;  %1396 = vmatmul.mubr.msk.f32.vlgmr.msra.gmra.mrb[0].mxu1 %vm422_vm1, %v419_v8  ;;  %s403_s13 = scalar_lea.vmem %s2164_s3, %s1345_s30  ;;  %s2065_s22 = scalar_lea.hbm %s2166_s5, %s1370_s28 }
  0x82   : > { %1399 = vmatpush3.xpose.msk.msra.mxu0 %vm422_vm1, %v412_v7  ;;  %1400 = vmatprep.mubr.msk.f32.mxu0 %vm1743_vm0, %v1742_v0  ;;  %v727_v13 = vld [vmem:[%s403_s13] sm:$0x3]  ;;  %s1099_s10 = scalar_lea.sflag [#allocation10], %s1988_s29  ;;  %s1617_s15 = scalar_lea.vmem %s2067_s16, 512 }
  0x83   : > { %1404 = vmatpush3.xpose.msk.msra.mxu1 %vm422_vm1, %v413_v10  ;;  %1405 = vmatprep.mubr.msk.f32.mxu1 %vm1743_vm0, %v1742_v0  ;;  %v728_v14 = vunpack.c.0.s8 %v727_v13  ;;  %p1618_p10 = scmp.ne.s32.totalorder %s2067_s16, %s1617_s15  ;;  %p2200_p8 = scmp.ne.s32.totalorder %s2185_s6, 0 }
  0x84   : > { %1408 = vmatprep.subr.mxu0 %v1742_v0  ;;  %1413 = vmatprep.subr.mxu1 %v1742_v0  ;;  %s1744_s12 = smov [#allocation9]  }
  0x85   : > { %1401 = vmatmul.mubr.msk.f32.vlgmr.msra.gmra.mrb[2].mxu0 %vm422_vm1, %v420_v11  ;;  %v729_v15 = vcvt.s32.f32 %v728_v14  ;;  %p1619_p9 = pnand %p1618_p10, %p2200_p8  ;;  %s1621_s14 = sshll.u32 %s1744_s12, 4  ;;  %s1622_s14 = int_to_ptr.vmem [resolvable:$false] %s1621_s14 }
  0x86   : > { %1406 = vmatmul.mubr.msk.f32.vlgmr.msra.gmra.mrb[2].mxu1 %vm422_vm1, %v421_v12  ;;  %1410 = vmatprep.mubr.msk.f32.mxu0 %vm1743_vm0, %v1742_v0  ;;  %s1623_s27 = scalar_lea.vmem %s1622_s14, 1024  ;;  %p1624_p1 = scmp.lt.s32.totalorder %s2067_s16, %s1622_s14 }
  0x87   : > { %1415 = vmatprep.mubr.msk.f32.mxu1 %vm1743_vm0, %v1742_v0  ;;  %v1354_v16 = vadd.f32 -1.0, %v729_v15  ;;  %1409 = vmatpush3.msra.mxu0 %v414_v38  ;;  %p1620_p12 = pneg %p1619_p9  ;;  %p1625_p6 = scmp.lt.s32.totalorder %s1623_s27, %s1617_s15 }
  0x88   : > { %1418 = vmatprep.subr.mxu0 %v1742_v0  ;;  %1414 = vmatpush3.msra.mxu1 %v415_v39 }
  0x89   : > { %v735_v17 = vmul.f32 1e+09, %v1354_v16  ;;  %1423 = vmatprep.subr.mxu1 %v1742_v0  ;;  %p1626_p13 = por %p1625_p6, %p1624_p1 }
  0x8b   : > { %p1627_p11 = pnand %p1626_p13, %p1620_p12 }
 0x154   : > { %v495_v18 = vpop.f32.mrb[0].mxu0  ;;  %v571_v19 = vpop.f32.mrb[0].mxu1 }
 0x155   : > { %v730_v20 = vmul.f32 %v729_v15, %v495_v18  ;;  %v1392_v21 = vpop.f32.mrb[1].mxu0  ;;  %v731_v22 = vmul.f32 %v729_v15, %v571_v19  ;;  %v1397_v23 = vpop.f32.mrb[1].mxu1 }
 0x157   : > { %v736_v24 = vadd.f32 %v735_v17, %v730_v20  ;;  %v737_v25 = vadd.f32 %v735_v17, %v731_v22 }
 0x158   : > { %v647_v26 = vpop.f32.mrb[2].mxu0 }
 0x159   : > { %v732_v27 = vmul.f32 %v729_v15, %v647_v26  ;;  %v1402_v28 = vpop.f32.mrb[3].mxu0  ;;  %v741_v29 = vsel %vm740_vm2, %v736_v24, -inf  ;;  %v723_v30 = vpop.f32.mrb[2].mxu1  ;;  %v744_v33 = vsel %vm740_vm2, %v737_v25, -inf }
 0x15a   : > { %742 = vmax.xlane.f32.xlu0 %v741_v29  ;;  %v733_v31 = vmul.f32 %v729_v15, %v723_v30  ;;  %v1407_v32 = vpop.f32.mrb[3].mxu1 }
 0x15b   : > { %v738_v34 = vadd.f32 %v735_v17, %v732_v27 }
 0x15c   : > { %v739_v35 = vadd.f32 %v735_v17, %v733_v31 }
 0x15d   : > { %v747_v36 = vsel %vm740_vm2, %v738_v34, -inf }
 0x15e   : > { %745 = vmax.xlane.f32.xlu0 %v744_v33  ;;  %748 = vmax.xlane.f32.xlu1 %v747_v36  ;;  %v750_v37 = vsel %vm740_vm2, %v739_v35, -inf }
 0x162   : > { %751 = vmax.xlane.f32.xlu1 %v750_v37 }
 0x1e7   : > { %v743_v40 = vpop.xlane.xlu0 %742 }
 0x1e8   : > { %v753_v41 = vsub.f32 %v736_v24, %v743_v40 }
 0x1ea   : > { %v757_v42 = vmul.f32 1.442695, %v753_v41 }
 0x1eb   : > { %v746_v43 = vpop.xlane.xlu0 %745  ;;  %v749_v44 = vpop.xlane.xlu1 %748 }
 0x1ec   : > { %1511 = vpow2.f32 %v757_v42  ;;  %v754_v45 = vsub.f32 %v737_v25, %v746_v43  ;;  %v755_v46 = vsub.f32 %v738_v34, %v749_v44 }
 0x1ee   : > { %v759_v47 = vmul.f32 1.442695, %v754_v45  ;;  %v761_v48 = vmul.f32 1.442695, %v755_v46 }
 0x1ef   : > { %v752_v49 = vpop.xlane.xlu1 %751 }
 0x1f0   : > { %1513 = vpow2.f32 %v759_v47  ;;  %v756_v50 = vsub.f32 %v739_v35, %v752_v49 }
 0x1f1   : > { %1515 = vpow2.f32 %v761_v48 }
 0x1f2   : > { %v763_v51 = vmul.f32 1.442695, %v756_v50 }
 0x1f4   : > { %1517 = vpow2.f32 %v763_v51 }
 0x1f6   : > { %v1512_v53 = vpop.eup %1511 }
 0x1f7   : > { %1411 = vmatmul.mubr.msk.f32.vlgmr.msra.gmra.mrb[4].mxu0 %vm740_vm2, %v1512_v53  ;;  %v765_v54 = vsel %vm740_vm2, %v1512_v53, 0.0 }
 0x1f8   : > { %766 = vadd.xlane.f32.xlu0 %v765_v54  ;;  %1419 = vmatpush3.msra.mxu0 %v416_v52 }
 0x1f9   : > { %1420 = vmatprep.mubr.msk.f32.mxu0 %vm1743_vm0, %v1742_v0 }
 0x1fa   : > { %v1514_v56 = vpop.eup %1513 }
 0x1fb   : > { %v1516_v57 = vpop.eup %1515  ;;  %1416 = vmatmul.mubr.msk.f32.vlgmr.msra.gmra.mrb[4].mxu1 %vm740_vm2, %v1514_v56  ;;  %v768_v58 = vsel %vm740_vm2, %v1514_v56, 0.0 }
 0x1fc   : > { %1421 = vmatmul.mubr.msk.f32.vlgmr.msra.gmra.mrb[6].mxu0 %vm740_vm2, %v1516_v57  ;;  %1424 = vmatpush3.msra.mxu1 %v417_v55  ;;  %v771_v59 = vsel %vm740_vm2, %v1516_v57, 0.0 }
 0x1fd   : > { %769 = vadd.xlane.f32.xlu1 %v768_v58  ;;  %772 = vadd.xlane.f32.xlu0 %v771_v59 }
 0x1fe   : > { %v1518_v60 = vpop.eup %1517  ;;  %1425 = vmatprep.mubr.msk.f32.mxu1 %vm1743_vm0, %v1742_v0 }
 0x1ff   : > { %1426 = vmatmul.mubr.msk.f32.vlgmr.msra.gmra.mrb[6].mxu1 %vm740_vm2, %v1518_v60  ;;  %v774_v61 = vsel %vm740_vm2, %v1518_v60, 0.0 }
 0x201   : > { %775 = vadd.xlane.f32.xlu1 %v774_v61 }
 0x285   : > { %v767_v62 = vpop.xlane.xlu0 %766 }
 0x286   : > { %1519 = vrcp.f32 %v767_v62 }
 0x28a   : > { %v773_v63 = vpop.xlane.xlu0 %772  ;;  %v770_v1 = vpop.xlane.xlu1 %769 }
 0x28b   : > { %1521 = vrcp.f32 %v773_v63 }
 0x28c   : > { %1523 = vrcp.f32 %v770_v1 }
 0x28e   : > { %v776_v2 = vpop.xlane.xlu1 %775 }
 0x28f   : > { %1525 = vrcp.f32 %v776_v2 }
 0x290   : > { %v1520_v3 = vpop.eup %1519 }
 0x291   : > { %v1085_v4 = vmul.f32 %v1520_v3, %v1512_v53 }
 0x293   : > { %1089 = vst.msk [vmem:[%s393_s11] sm:$0xff] %vm740_vm2, %v1085_v4 }
 0x295   : > { %v1522_v0 = vpop.eup %1521 }
 0x296   : > { %v1524_v5 = vpop.eup %1523  ;;  %v1087_v6 = vmul.f32 %v1522_v0, %v1516_v57 }
 0x297   : > { %v1086_v7 = vmul.f32 %v1524_v5, %v1514_v56 }
 0x298   : > { %1091 = vst.msk [vmem:[%s393_s11 + $0x10] sm:$0xff] %vm740_vm2, %v1087_v6 }
 0x299   : > { %v1526_v8 = vpop.eup %1525  ;;  %1090 = vst.msk [vmem:[%s393_s11 + $0x8] sm:$0xff] %vm740_vm2, %v1086_v7 }
 0x29a   : > { %v1088_v9 = vmul.f32 %v1526_v8, %v1518_v60 }
 0x29c   : > { %1092 = vst.msk [vmem:[%s393_s11 + $0x18] sm:$0xff] %vm740_vm2, %v1088_v9 }
 0x29d   : > { %1630 = shalt.err (!%p1627_p11)
}
 0x29e   : > { %s1631_s9 = scalar_lea.hbm %s2065_s22, 512  ;;  %s1635_s30 = scalar_lea.hbm %s2166_s5, 1024 }
 0x29f   : > { %p1632_p2 = scmp.ne.s32.totalorder %s2065_s22, %s1631_s9  ;;  %p1636_p4 = scmp.lt.u32.totalorder %s2065_s22, %s2166_s5 }
 0x2a0   : > { %p1637_p3 = scmp.lt.u32.totalorder %s1635_s30, %s1631_s9  ;;  %p1639_p10 = scmp.lt.u32.totalorder %s1631_s9, %s2065_s22 }
 0x2a1   : > { %p1633_p5 = pnand %p1632_p2, %p2200_p8 }
 0x2a2   : > { %p1638_p0 = por %p1637_p3, %p1636_p4 }
 0x2a3   : > { %p1634_p7 = pneg %p1633_p5 }
 0x2a4   : > { %p1640_p9 = por %p1639_p10, %p1638_p0 }
 0x2a6   : > { %p1641_p12 = pnand %p1640_p9, %p1634_p7 }
 0x2a8   : > { %1644 = shalt.err (!%p1641_p12)
}
 0x2a9   : > { %s1745_s13 = smov 128   ;;  %s1746_s26 = smov 8  }
 0x2aa   : > { %1435 = dma.vmem_to_hbm [thread:$0]  (%p2200_p8), %s2067_s16, 512, %s2065_s22, %s1099_s10, %s1745_s13, %s1745_s13, %s1746_s26  }
 0x2ab   : > { %s386_s11 = scalar_lea.vmem [#allocation8], %s1991_s25  ;;  %s2108_s1 = scalar_lea.hbm %s2165_s4, %s1370_s28 }
 0x2ac   : > { %s1115_s8 = sshll.u32 %s386_s11, 4  ;;  %s1094_s22 = scalar_lea.sflag [#allocation4], %s1988_s29  ;;  %s2100_s8 = int_to_ptr.vmem [resolvable:$true] %s1115_s8 }
 0x2ad   : > { %s1645_s10 = scalar_lea.vmem %s2100_s8, 512  ;;  %s1747_s15 = smov [#allocation8]  }
 0x2ae   : > { %p1646_p1 = scmp.ne.s32.totalorder %s2100_s8, %s1645_s10  ;;  %s1649_s12 = sshll.u32 %s1747_s15, 4  ;;  %s1650_s12 = int_to_ptr.vmem [resolvable:$false] %s1649_s12 }
 0x2af   : > { %s1651_s14 = scalar_lea.vmem %s1650_s12, 1024  ;;  %p1652_p11 = scmp.lt.s32.totalorder %s2100_s8, %s1650_s12 }
 0x2b0   : > { %p1647_p6 = pnand %p1646_p1, %p2200_p8  ;;  %p1653_p2 = scmp.lt.s32.totalorder %s1651_s14, %s1645_s10 }
 0x2b2   : > { %p1648_p13 = pneg %p1647_p6  ;;  %p1654_p5 = por %p1653_p2, %p1652_p11 }
 0x2b4   : > { %p1655_p7 = pnand %p1654_p5, %p1648_p13 }
 0x2ca   : > { %v854_v10 = vpop.f32.mrb[4].mxu0 }
 0x2cb   : > { %v1077_v11 = vmul.f32 %v1520_v3, %v854_v10  ;;  %v1412_v12 = vpop.f32.mrb[5].mxu0 }
 0x2cd   : > { %1081 = vst.msk [vmem:[%s386_s11] sm:$0xff] %vm422_vm1, %v1077_v11 }
 0x2ce   : > { %v927_v13 = vpop.f32.mrb[4].mxu1 }
 0x2cf   : > { %v1078_v14 = vmul.f32 %v1524_v5, %v927_v13  ;;  %v1000_v15 = vpop.f32.mrb[6].mxu0  ;;  %v1417_v16 = vpop.f32.mrb[5].mxu1 }
 0x2d0   : > { %v1079_v17 = vmul.f32 %v1522_v0, %v1000_v15  ;;  %v1422_v18 = vpop.f32.mrb[7].mxu0 }
 0x2d1   : > { %1082 = vst.msk [vmem:[%s386_s11 + $0x8] sm:$0xff] %vm422_vm1, %v1078_v14 }
 0x2d2   : > { %1083 = vst.msk [vmem:[%s386_s11 + $0x10] sm:$0xff] %vm422_vm1, %v1079_v17  ;;  %v1073_v19 = vpop.f32.mrb[6].mxu1 }
 0x2d3   : > { %v1080_v20 = vmul.f32 %v1526_v8, %v1073_v19  ;;  %v1427_v21 = vpop.f32.mrb[7].mxu1 }
 0x2d5   : > { %1084 = vst.msk [vmem:[%s386_s11 + $0x18] sm:$0xff] %vm422_vm1, %v1080_v20 }
 0x2d6   : > { %1658 = shalt.err (!%p1655_p7)
}
 0x2d7   : > { %s1659_s21 = scalar_lea.hbm %s2108_s1, 512  ;;  %s1663_s9 = scalar_lea.hbm %s2165_s4, 1024 }
 0x2d8   : > { %p1660_p4 = scmp.ne.s32.totalorder %s2108_s1, %s1659_s21  ;;  %p1664_p10 = scmp.lt.u32.totalorder %s2108_s1, %s2165_s4 }
 0x2d9   : > { %p1665_p9 = scmp.lt.u32.totalorder %s1663_s9, %s1659_s21  ;;  %p1667_p1 = scmp.lt.u32.totalorder %s1659_s21, %s2108_s1 }
 0x2da   : > { %p1661_p3 = pnand %p1660_p4, %p2200_p8 }
 0x2db   : > { %p1666_p12 = por %p1665_p9, %p1664_p10 }
 0x2dc   : > { %p1662_p0 = pneg %p1661_p3 }
 0x2dd   : > { %p1668_p6 = por %p1667_p1, %p1666_p12 }
 0x2df   : > { %p1669_p13 = pnand %p1668_p6, %p1662_p0 }
 0x2e1   : > { %1672 = shalt.err (!%p1669_p13)
}
 0x2e2   : > { %1434 = dma.vmem_to_hbm [thread:$0]  (%p2200_p8), %s2100_s8, 512, %s2108_s1, %s1094_s22, %s1745_s13, %s1745_s13, %s1746_s26  }
 0x2e3 PF: > { %s2201_s30 = sld [smem:[#allocation19_spill]]  ;;  %s2202_s23 = sld [smem:[#allocation16_spill]] }
 0x2e4   : > { %s1149_s7 = sand.u32 1, %s1715_s18  }
 0x2e5   : > { %s1150_s11 = scalar_lea.sflag [#allocation4], %s1149_s7 }
 0x2e9   : > { %p2203_p11 = scmp.ne.s32.totalorder %s2201_s30, 0  ;;  %p2204_p2 = scmp.ge.s32.totalorder %s2202_s23, 2 }
 0x2eb   : > { %p1449_p5 = pnand %p2204_p2, %p2203_p11 }
 0x2ed   : > { %1706 = dma.done.wait (!%p1449_p5), %s1150_s11, 512  }
 0x2ee   : > { %1708 = vsyncadd (!%p1449_p5), %s1150_s11, 4294966784  ;;  %s1159_s6 = scalar_lea.sflag [#allocation10], %s1149_s7 }
 0x2ef   : > { %1710 = dma.done.wait (!%p1449_p5), %s1159_s6, 512  }
 0x2f0   : > { %1712 = vsyncadd (!%p1449_p5), %s1159_s6, 4294966784  ;;  %s28_s23 = sadd.s32 1, %s2202_s23   ;;  %s2205_s29 = sld [smem:[#allocation18_spill]] }
 0x2f1   : > { %p25_p7 = scmp.ge.s32.totalorder %s28_s23, 4   ;;  %s2206_s21 = sld [smem:[#allocation15_spill]] }
 0x2f2   : > { %s2207_s22 = sld [smem:[#allocation17_spill]]  ;;  %s2208_s18 = smov %s1719_s19 }
 0x2f3   : > { %s2209_s19 = smov %s1723_s20  ;;  %27 = sbr.rel (!%p25_p7) target bundleno = 12 (0xc), region = 125 }
 0x2f6   : > { %s2210_s20 = smov %s2205_s29 }
 0x2fa   :  { %1164 = vsyncpa [#allocation3], 1 }
 0x2fb   :  { %1166 = vsyncpa [#allocation3 + $0x1], 1 }
 0x2fc   :  { %1167 = vsyncpa [#allocation6], 1 }
 0x2fd   :  { %1169 = vsyncpa [#allocation6 + $0x1], 1 }
 0x2fe   :  { %1170 = vsyncpa [#allocation4], 1 }
 0x2ff   :  { %1172 = vsyncpa [#allocation4 + $0x1], 1 }
 0x300   :  { %1173 = vsyncpa [#allocation10], 1 }
 0x301   :  { %1175 = vsyncpa [#allocation10 + $0x1], 1 }

</bundles_post_ra>
